<compile_context>
chip_gen: v7x
topology: tpu7x:2x2x1
jax: 0.10.0
libtpu: 0.0.40
codegen_flags: <defaults>
</compile_context>

<pallas_src>
import functools

import jax
import jax.numpy as jnp
from jax.experimental import pallas as pl
from jax.experimental.pallas import tpu as pltpu


# ----------------------------------------------------------------------------
# Pallas kernel: entire forward for one batch tile
# ----------------------------------------------------------------------------
def cnn_fused_kernel(idx_ref, emb_ref, wconv_ref, bconv_ref, fsz_ref,
                     wmlp_ref, bmlp_ref, out_ref,
                     *, tile_b, seq_len, maxf, pos_offset):
    """idx_ref   : (tile_b*L, 2) int32   [word_idx, pos_idx] per token
       emb_ref   : (VT, D)       bf16    combined (word | pos) embedding table
       wconv_ref : (maxf*D, Fp)  bf16    flattened conv weights, all branches
       bconv_ref : (1, Fp)       f32     conv biases (zero in pad lanes)
       fsz_ref   : (1, Fp)       int32   filter size per output channel
       wmlp_ref  : (Fp, Cp)      bf16    fused linear0 @ linear weight
       bmlp_ref  : (1, Cp)       f32     fused bias  b0 @ w1 + b1
       out_ref   : (tile_b, Cp)  f32     padded logits (lane-dense store)
    """
    rows = tile_b * seq_len
    vt = emb_ref.shape[0]

    # --- embedding gather as ONE multi-hot matmul (small-vocab design) ------
    # TODO(synk): for realistic vocab sizes replace this with a scalar-
    # prefetched DMA gather instead of keeping the table VMEM-resident.
    idx = idx_ref[...]
    lane = jax.lax.broadcasted_iota(jnp.int32, (rows, vt), 1)
    hot = jnp.logical_or(lane == idx[:, 0:1],
                         lane == idx[:, 1:2] + pos_offset)
    embed = jnp.dot(hot.astype(jnp.bfloat16), emb_ref[...],
                    preferred_element_type=jnp.float32)           # (rows, D)

    # --- im2col: lane-concat of maxf sublane-rolled copies (XLU) ------------
    parts = [embed]
    for k in range(1, maxf):
        parts.append(pltpu.roll(embed, shift=rows - k, axis=0))   # row t <- t+k
    im2col = jnp.concatenate(parts, axis=1).astype(jnp.bfloat16)  # (rows, maxf*D)

    # --- all conv branches in one matmul, + bias + ReLU ----------------------
    z = jnp.dot(im2col, wconv_ref[...], preferred_element_type=jnp.float32)
    z = jnp.maximum(z + bconv_ref[...], 0.0)                      # (rows, Fp)

    # --- mask invalid time positions (per branch + cross-sentence roll junk),
    #     then global max-pool over time (no modulo: iota on time axis) -------
    fp = z.shape[1]
    z = z.reshape(tile_b, seq_len, fp)
    t = jax.lax.broadcasted_iota(jnp.int32, (tile_b, seq_len, fp), 1)
    thr = (seq_len - fsz_ref[...]).reshape(1, 1, fp)
    z = jnp.where(t <= thr, z, 0.0)
    pooled = jnp.max(z, axis=1)                                   # (tile_b, Fp)

    # TODO(synk): dropout is identity at inference; training-mode mask not implemented.

    # --- fused linear0 . linear (exact: no activation between them) ----------
    out_ref[...] = (jnp.dot(pooled.astype(jnp.bfloat16), wmlp_ref[...],
                            preferred_element_type=jnp.float32)
                    + bmlp_ref[...])


# ----------------------------------------------------------------------------
# Host-side (one-time) parameter packing
# ----------------------------------------------------------------------------
def pack_params(params):
    fs_list = tuple(params["filters_size"])
    maxf = max(fs_list)
    V, Ew = params["word_embedding"].shape
    P, Ep = params["pos_embedding"].shape
    D = Ew + Ep
    F_ = params["conv_w"][0].shape[0]
    flat = len(fs_list) * F_
    C = params["w1"].shape[1]

    VT = pl.cdiv(V + P, 128) * 128        # embedding-matmul K, lane-aligned
    Fp = pl.cdiv(flat, 128) * 128         # conv channels padded lane-dense (48 -> 128)
    Cp = pl.cdiv(C, 128) * 128            # classes padded (5 -> 128)
    KD = maxf * D

    # combined (word | pos) embedding table
    emb = jnp.zeros((VT, D), jnp.float32)
    emb = emb.at[:V, :Ew].set(params["word_embedding"].astype(jnp.float32))
    emb = emb.at[V:V + P, Ew:].set(params["pos_embedding"].astype(jnp.float32))

    # conv weights flattened to im2col layout, zero-padded, lane-concatenated
    w_conv = jnp.zeros((KD, Fp), jnp.float32)
    b_conv = jnp.zeros((1, Fp), jnp.float32)
    fsz = jnp.ones((1, Fp), jnp.int32)    # pad channels behave as fs=1 (zero-valued anyway)
    for j, (fs, w, b) in enumerate(zip(fs_list, params["conv_w"], params["conv_b"])):
        w2d = jnp.transpose(jnp.reshape(w.astype(jnp.float32), (F_, fs * D)))
        w_conv = w_conv.at[:fs * D, j * F_:(j + 1) * F_].set(w2d)
        b_conv = b_conv.at[0, j * F_:(j + 1) * F_].set(b.astype(jnp.float32))
        fsz = fsz.at[0, j * F_:(j + 1) * F_].set(fs)

    # fuse linear0 @ linear (no nonlinearity between them), zero-pad to (Fp, Cp)
    w_fused = params["w0"].astype(jnp.float32) @ params["w1"].astype(jnp.float32)
    b_fused = (params["b0"].astype(jnp.float32) @ params["w1"].astype(jnp.float32)
               + params["b1"].astype(jnp.float32))
    w_mlp = jnp.zeros((Fp, Cp), jnp.float32).at[:flat, :C].set(w_fused)
    b_mlp = jnp.zeros((1, Cp), jnp.float32).at[0, :C].set(b_fused)

    packed = dict(emb=emb.astype(jnp.bfloat16),
                  w_conv=w_conv.astype(jnp.bfloat16),
                  b_conv=b_conv, fsz=fsz,
                  w_mlp=w_mlp.astype(jnp.bfloat16), b_mlp=b_mlp)
    cfg = dict(maxf=maxf, V=V, n_classes=C, Cp=Cp, filters_size=fs_list)
    return packed, cfg


# ----------------------------------------------------------------------------
# Forward wrapper (one batch-gridded pallas_call per forward)
# ----------------------------------------------------------------------------
def cnn_forward(packed, cfg, sdp_idx, pos_sdp_idx):
    B, L = sdp_idx.shape
    maxf, Cp = cfg["maxf"], cfg["Cp"]
    assert maxf <= L

    # batch tile: aim for tile_b*L = 128 MXU rows; fall back to one tile
    tile_b = 16 if (B % 16 == 0) else B
    rows = tile_b * L
    grid = (B // tile_b,)

    # only wrapper-side prep left: stack the raw (word, pos) ids per token
    idx_pack = jnp.stack([sdp_idx.reshape(-1).astype(jnp.int32),
                          pos_sdp_idx.reshape(-1).astype(jnp.int32)], axis=1)

    VT, D = packed["emb"].shape
    KD, Fp = packed["w_conv"].shape
    flops = 2 * (B * L * VT * D + B * L * KD * Fp + B * Fp * Cp)
    bytes_accessed = (sum(int(v.size) * v.dtype.itemsize for v in packed.values())
                      + int(idx_pack.size) * 4 + B * Cp * 4)

    kernel = functools.partial(cnn_fused_kernel, tile_b=tile_b, seq_len=L,
                               maxf=maxf, pos_offset=cfg["V"])

    out = pl.pallas_call(
        kernel,
        grid=grid,
        in_specs=[
            pl.BlockSpec((rows, 2), lambda i: (i, 0)),                 # streamed per tile
            pl.BlockSpec(packed["emb"].shape, lambda i: (0, 0)),       # weights: constant
            pl.BlockSpec(packed["w_conv"].shape, lambda i: (0, 0)),
            pl.BlockSpec(packed["b_conv"].shape, lambda i: (0, 0)),
            pl.BlockSpec(packed["fsz"].shape, lambda i: (0, 0)),
            pl.BlockSpec(packed["w_mlp"].shape, lambda i: (0, 0)),
            pl.BlockSpec(packed["b_mlp"].shape, lambda i: (0, 0)),
        ],
        out_specs=pl.BlockSpec((tile_b, Cp), lambda i: (i, 0)),
        out_shape=jax.ShapeDtypeStruct((B, Cp), jnp.float32),
        compiler_params=pltpu.CompilerParams(dimension_semantics=("parallel",)),
        cost_estimate=pl.CostEstimate(flops=flops, transcendentals=0,
                                      bytes_accessed=bytes_accessed),
    )(idx_pack, packed["emb"], packed["w_conv"], packed["b_conv"], packed["fsz"],
      packed["w_mlp"], packed["b_mlp"])
    return out[:, :cfg["n_classes"]]


# ----------------------------------------------------------------------------
# Pure-JAX reference mirroring the PyTorch forward (f32 throughout)
# ----------------------------------------------------------------------------
def cnn_forward_ref(params, sdp_idx, pos_sdp_idx):
    word_emb = params["word_embedding"][sdp_idx]
    pos_emb = params["pos_embedding"][pos_sdp_idx]
    feature = jnp.concatenate([word_emb, pos_emb], axis=2)
    B, L, D = feature.shape
    pooled = []
    for fs, w, b in zip(params["filters_size"], params["conv_w"], params["conv_b"]):
        L_out = L - fs + 1
        acc = jnp.zeros((B, L_out, w.shape[0]), jnp.float32)
        for k in range(fs):
            acc += jnp.einsum("bld,fd->blf", feature[:, k:k + L_out, :], w[:, k, :])
        acc = jax.nn.relu(acc + b[None, None, :])
        pooled.append(jnp.max(acc, axis=1))
    sent = jnp.concatenate(pooled, axis=1)
    h = sent @ params["w0"] + params["b0"]
    return h @ params["w1"] + params["b1"]


# ----------------------------------------------------------------------------
# Main
# ----------------------------------------------------------------------------
if __name__ == "__main__":
    key = jax.random.PRNGKey(0)

    # Hyperparameters (small, consistent with the module's __init__ / forward;
    # B=32 so the batch grid + 128-row MXU tiles are exercised)
    B, L = 32, 8
    vocab_size, embedding_size = 20, 24
    pos_size, pos_embedding_size = 10, 8
    filters_size = [2, 3, 4]
    n_filters = 16
    n_classes = 5
    feature_dims = embedding_size + pos_embedding_size       # 32
    flat_size = n_filters * len(filters_size)                 # 48
    hidden = 250

    keys = jax.random.split(key, 12)
    params = {
        "word_embedding": 0.1 * jax.random.normal(keys[0], (vocab_size, embedding_size), jnp.float32),
        "pos_embedding": 0.1 * jax.random.normal(keys[1], (pos_size, pos_embedding_size), jnp.float32),
        "filters_size": filters_size,
        "conv_w": [0.1 * jax.random.normal(keys[2 + i], (n_filters, fs, feature_dims), jnp.float32)
                   for i, fs in enumerate(filters_size)],
        "conv_b": [0.01 * jax.random.normal(keys[5 + i], (n_filters,), jnp.float32)
                   for i in range(len(filters_size))],
        "w0": 0.1 * jax.random.normal(keys[8], (flat_size, hidden), jnp.float32),
        "b0": 0.01 * jax.random.normal(keys[9], (hidden,), jnp.float32),
        "w1": 0.1 * jax.random.normal(keys[10], (hidden, n_classes), jnp.float32),
        "b1": 0.01 * jax.random.normal(keys[11], (n_classes,), jnp.float32),
    }

    kidx = jax.random.split(jax.random.PRNGKey(42), 2)
    sdp_idx = jax.random.randint(kidx[0], (B, L), 0, vocab_size, dtype=jnp.int32)
    pos_sdp_idx = jax.random.randint(kidx[1], (B, L), 0, pos_size, dtype=jnp.int32)

    packed, cfg = pack_params(params)
    fwd = jax.jit(functools.partial(cnn_forward, packed, cfg))

    out = jax.block_until_ready(fwd(sdp_idx, pos_sdp_idx))

    ref = cnn_forward_ref(params, sdp_idx, pos_sdp_idx)
    assert out.shape == (B, n_classes)
    # tolerance relaxed for bf16 matmul operands (f32 MXU accumulation)
    assert jnp.allclose(out, ref, atol=2e-2, rtol=2e-2), (out, ref)

    print("KERNEL_OK")
</pallas_src>

<mosaic_0001>
module attributes {stable_mosaic.version = 11 : i64} {
  func.func @cnn_fused_kernel(%arg0: i32, %arg1: memref<128x2xi32, #tpu.memory_space<vmem>>, %arg2: memref<128x32xbf16, #tpu.memory_space<vmem>>, %arg3: memref<128x128xbf16, #tpu.memory_space<vmem>>, %arg4: memref<1x128xf32, #tpu.memory_space<vmem>>, %arg5: memref<1x128xi32, #tpu.memory_space<vmem>>, %arg6: memref<128x128xbf16, #tpu.memory_space<vmem>>, %arg7: memref<1x128xf32, #tpu.memory_space<vmem>>, %arg8: memref<16x128xf32, #tpu.memory_space<vmem>>) attributes {dimension_semantics = [#tpu.dimension_semantics<parallel>], iteration_bounds = array<i64: 2>, scalar_prefetch = 0 : i64, scratch_operands = 0 : i64, tpu.core_type = #tpu.core_type<tc>, window_params = [{transform_indices = @transform_0, window_bounds = array<i64: 128, 2>}, {pipeline_mode = #tpu.pipeline_mode<synchronous>, transform_indices = @transform_1, window_bounds = array<i64: 128, 32>}, {pipeline_mode = #tpu.pipeline_mode<synchronous>, transform_indices = @transform_2, window_bounds = array<i64: 128, 128>}, {pipeline_mode = #tpu.pipeline_mode<synchronous>, transform_indices = @transform_3, window_bounds = array<i64: 1, 128>}, {pipeline_mode = #tpu.pipeline_mode<synchronous>, transform_indices = @transform_4, window_bounds = array<i64: 1, 128>}, {pipeline_mode = #tpu.pipeline_mode<synchronous>, transform_indices = @transform_5, window_bounds = array<i64: 128, 128>}, {pipeline_mode = #tpu.pipeline_mode<synchronous>, transform_indices = @transform_6, window_bounds = array<i64: 1, 128>}, {transform_indices = @transform_7, window_bounds = array<i64: 16, 128>}]} {
    %c0 = arith.constant 0 : index
    %c0_0 = arith.constant 0 : index
    %0 = vector.load %arg1[%c0, %c0_0] : memref<128x2xi32, #tpu.memory_space<vmem>>, vector<128x2xi32>
    %1 = tpu.iota {dimensions = array<i32: 1>} : vector<128x128xi32>
    %2 = vector.extract_strided_slice %0 {offsets = [0, 0], sizes = [128, 1], strides = [1, 1]} : vector<128x2xi32> to vector<128x1xi32>
    %3 = vector.broadcast %2 : vector<128x1xi32> to vector<128x128xi32>
    %4 = arith.cmpi eq, %1, %3 : vector<128x128xi32>
    %5 = vector.extract_strided_slice %0 {offsets = [0, 1], sizes = [128, 1], strides = [1, 1]} : vector<128x2xi32> to vector<128x1xi32>
    %c20_i32 = arith.constant 20 : i32
    %6 = vector.broadcast %c20_i32 : i32 to vector<128x1xi32>
    %7 = arith.addi %5, %6 : vector<128x1xi32>
    %8 = vector.broadcast %7 : vector<128x1xi32> to vector<128x128xi32>
    %9 = arith.cmpi eq, %1, %8 : vector<128x128xi32>
    %10 = arith.ori %4, %9 : vector<128x128xi1>
    %11 = arith.extui %10 : vector<128x128xi1> to vector<128x128xi32>
    %12 = arith.sitofp %11 : vector<128x128xi32> to vector<128x128xf32>
    %13 = arith.truncf %12 : vector<128x128xf32> to vector<128x128xbf16>
    %c0_1 = arith.constant 0 : index
    %c0_2 = arith.constant 0 : index
    %14 = vector.load %arg2[%c0_1, %c0_2] : memref<128x32xbf16, #tpu.memory_space<vmem>>, vector<128x32xbf16>
    %cst = arith.constant dense<0.000000e+00> : vector<128x32xf32>
    %15 = tpu.matmul %13, %14, %cst {dimension_numbers = #tpu.dot_dimension_numbers<[1], [0], [0], [1], [0, 0, 1, 1], [], []>} : vector<128x128xbf16>, vector<128x32xbf16>, vector<128x32xf32> -> vector<128x32xf32>
    %c127_i32 = arith.constant 127 : i32
    %16 = tpu.dynamic_rotate %15 by %c127_i32 dim 0 : vector<128x32xf32>, i32 -> vector<128x32xf32>
    %c126_i32 = arith.constant 126 : i32
    %17 = tpu.dynamic_rotate %15 by %c126_i32 dim 0 : vector<128x32xf32>, i32 -> vector<128x32xf32>
    %c125_i32 = arith.constant 125 : i32
    %18 = tpu.dynamic_rotate %15 by %c125_i32 dim 0 : vector<128x32xf32>, i32 -> vector<128x32xf32>
    %19 = tpu.concatenate %15, %16, %17, %18 in 1 : vector<128x32xf32>, vector<128x32xf32>, vector<128x32xf32>, vector<128x32xf32> -> vector<128x128xf32>
    %20 = arith.truncf %19 : vector<128x128xf32> to vector<128x128xbf16>
    %c0_3 = arith.constant 0 : index
    %c0_4 = arith.constant 0 : index
    %21 = vector.load %arg3[%c0_3, %c0_4] : memref<128x128xbf16, #tpu.memory_space<vmem>>, vector<128x128xbf16>
    %cst_5 = arith.constant dense<0.000000e+00> : vector<128x128xf32>
    %22 = tpu.matmul %20, %21, %cst_5 {dimension_numbers = #tpu.dot_dimension_numbers<[1], [0], [0], [1], [0, 0, 1, 1], [], []>} : vector<128x128xbf16>, vector<128x128xbf16>, vector<128x128xf32> -> vector<128x128xf32>
    %c0_6 = arith.constant 0 : index
    %c0_7 = arith.constant 0 : index
    %23 = vector.load %arg4[%c0_6, %c0_7] : memref<1x128xf32, #tpu.memory_space<vmem>>, vector<1x128xf32>
    %24 = vector.broadcast %23 : vector<1x128xf32> to vector<128x128xf32>
    %25 = arith.addf %22, %24 : vector<128x128xf32>
    %cst_8 = arith.constant 0.000000e+00 : f32
    %26 = vector.broadcast %cst_8 : f32 to vector<128x128xf32>
    %27 = arith.maximumf %25, %26 : vector<128x128xf32>
    %28 = vector.shape_cast %27 : vector<128x128xf32> to vector<16x8x128xf32>
    %29 = tpu.iota {dimensions = array<i32: 1>} : vector<16x8x128xi32>
    %c0_9 = arith.constant 0 : index
    %c0_10 = arith.constant 0 : index
    %30 = vector.load %arg5[%c0_9, %c0_10] : memref<1x128xi32, #tpu.memory_space<vmem>>, vector<1x128xi32>
    %c8_i32 = arith.constant 8 : i32
    %31 = vector.broadcast %c8_i32 : i32 to vector<1x128xi32>
    %32 = arith.subi %31, %30 : vector<1x128xi32>
    %33 = vector.shape_cast %32 : vector<1x128xi32> to vector<1x1x128xi32>
    %34 = vector.broadcast %33 : vector<1x1x128xi32> to vector<16x8x128xi32>
    %35 = arith.cmpi sle, %29, %34 : vector<16x8x128xi32>
    %cst_11 = arith.constant 0.000000e+00 : f32
    %36 = vector.broadcast %cst_11 : f32 to vector<16x8x128xf32>
    %37 = arith.select %35, %28, %36 : vector<16x8x128xi1>, vector<16x8x128xf32>
    %cst_12 = arith.constant dense<0xFF800000> : vector<16x128xf32>
    %38 = vector.multi_reduction <maximumf>, %37, %cst_12 [1] : vector<16x8x128xf32> to vector<16x128xf32>
    %39 = arith.truncf %38 : vector<16x128xf32> to vector<16x128xbf16>
    %c0_13 = arith.constant 0 : index
    %c0_14 = arith.constant 0 : index
    %40 = vector.load %arg6[%c0_13, %c0_14] : memref<128x128xbf16, #tpu.memory_space<vmem>>, vector<128x128xbf16>
    %cst_15 = arith.constant dense<0.000000e+00> : vector<16x128xf32>
    %41 = tpu.matmul %39, %40, %cst_15 {dimension_numbers = #tpu.dot_dimension_numbers<[1], [0], [0], [1], [0, 0, 1, 1], [], []>} : vector<16x128xbf16>, vector<128x128xbf16>, vector<16x128xf32> -> vector<16x128xf32>
    %c0_16 = arith.constant 0 : index
    %c0_17 = arith.constant 0 : index
    %42 = vector.load %arg7[%c0_16, %c0_17] : memref<1x128xf32, #tpu.memory_space<vmem>>, vector<1x128xf32>
    %43 = vector.broadcast %42 : vector<1x128xf32> to vector<16x128xf32>
    %44 = arith.addf %41, %43 : vector<16x128xf32>
    %c0_18 = arith.constant 0 : index
    %c0_19 = arith.constant 0 : index
    %45 = vector.load %arg8[%c0_18, %c0_19] : memref<16x128xf32, #tpu.memory_space<vmem>>, vector<16x128xf32>
    tpu.vector_store %arg8[%c0_18, %c0_19], %44 {strides = array<i32>} : memref<16x128xf32, #tpu.memory_space<vmem>>, vector<16x128xf32>,
    return
  }
  func.func @transform_0(%arg0: i32) -> (i32, i32) {
    %c0_i32 = arith.constant 0 : i32
    %c0_i32_0 = arith.constant 0 : i32
    return %arg0, %c0_i32 : i32, i32
  }
  func.func @transform_1(%arg0: i32) -> (i32, i32) {
    %c0_i32 = arith.constant 0 : i32
    %c0_i32_0 = arith.constant 0 : i32
    %c0_i32_1 = arith.constant 0 : i32
    return %c0_i32, %c0_i32_0 : i32, i32
  }
  func.func @transform_2(%arg0: i32) -> (i32, i32) {
    %c0_i32 = arith.constant 0 : i32
    %c0_i32_0 = arith.constant 0 : i32
    %c0_i32_1 = arith.constant 0 : i32
    return %c0_i32, %c0_i32_0 : i32, i32
  }
  func.func @transform_3(%arg0: i32) -> (i32, i32) {
    %c0_i32 = arith.constant 0 : i32
    %c0_i32_0 = arith.constant 0 : i32
    %c0_i32_1 = arith.constant 0 : i32
    return %c0_i32, %c0_i32_0 : i32, i32
  }
  func.func @transform_4(%arg0: i32) -> (i32, i32) {
    %c0_i32 = arith.constant 0 : i32
    %c0_i32_0 = arith.constant 0 : i32
    %c0_i32_1 = arith.constant 0 : i32
    return %c0_i32, %c0_i32_0 : i32, i32
  }
  func.func @transform_5(%arg0: i32) -> (i32, i32) {
    %c0_i32 = arith.constant 0 : i32
    %c0_i32_0 = arith.constant 0 : i32
    %c0_i32_1 = arith.constant 0 : i32
    return %c0_i32, %c0_i32_0 : i32, i32
  }
  func.func @transform_6(%arg0: i32) -> (i32, i32) {
    %c0_i32 = arith.constant 0 : i32
    %c0_i32_0 = arith.constant 0 : i32
    %c0_i32_1 = arith.constant 0 : i32
    return %c0_i32, %c0_i32_0 : i32, i32
  }
  func.func @transform_7(%arg0: i32) -> (i32, i32) {
    %c0_i32 = arith.constant 0 : i32
    %c0_i32_0 = arith.constant 0 : i32
    return %arg0, %c0_i32 : i32, i32
  }
}

</mosaic_0001>

<bundles_post_ra>
// kernel: cnn_forward.1
= control target key start
LH: loop header
LB: loop body
LE: loop exit
PB: predicated region body
PF: predicated region fallthrough
CT: control target
= control target key end

     0   :  { %s1985_s24 = smov 0   ;;  %s2529_s0 = inlined_call_operand.vmem [shape: s32[256,2], index: 0, kind: input, shape index: {}]   ;;  %s2530_s1 = inlined_call_operand.vmem [shape: bf16[128,32], index: 1, kind: input, shape index: {}]   ;;  %s2531_s2 = inlined_call_operand.vmem [shape: bf16[128,128], index: 2, kind: input, shape index: {}]   ;;  %s2532_s3 = inlined_call_operand.vmem [shape: f32[1,128], index: 3, kind: input, shape index: {}]   ;;  %s2533_s4 = inlined_call_operand.vmem [shape: s32[1,128], index: 4, kind: input, shape index: {}]   ;;  %s2534_s5 = inlined_call_operand.vmem [shape: bf16[128,128], index: 5, kind: input, shape index: {}]   ;;  %s2535_s6 = inlined_call_operand.vmem [shape: f32[1,128], index: 6, kind: input, shape index: {}]   ;;  %s2536_s7 = inlined_call_operand.vmem [shape: f32[32,128], index: 7, kind: output, shape index: {}]  }
   0x1 LB: > { %s1558_s25 = sadd.s32 4294967295, %s1935_s24   ;;  %p1562_p0 = scmp.ge.s32.totalorder %s1935_s24, 1  ;;  %s1935_s24 = sphi %s1985_s24, %s17_s24  }
   0x2   : > { %p238_p1 = scmp.lt.s32.totalorder %s1935_s24, 3 }
   0x4   : > { %p239_p2 = pnand %p1562_p0, %p238_p1 }
   0x5   : > { %s1563_s26 = sshll.u32 (!%p239_p2), %s1558_s25, 4  ;;  %v1905_v0 = vld [vmem:[%s2530_s1] sm:$0xff] (!%p239_p2)   ;;  %v1937_v1 = vmov (!%p239_p2), 0   ;;  %v1938_v2 = vmov (!%p239_p2), 1   ;;  %v1906_v3 = vld [vmem:[%s2530_s1 + $0x8] sm:$0xff] (!%p239_p2)   ;;  %v1907_v13 = vld [vmem:[%s2530_s1 + $0x10] sm:$0xff] (!%p239_p2)   ;;  %v299_v48 = vlaneseq (!%p239_p2) }
   0x6   : > { %242 = sbr.rel (%p239_p2) target bundleno = 1051 (0x41b), region = 48  ;;  %1768 = vset.pattern.permute.xlu1 (!%p239_p2), %v1937_v1  ;;  %p271_p3 = scmp.lt.s32.totalorder (!%p239_p2), %s1563_s26, 31  ;;  %1770 = vset.pattern.permute.xlu0 (!%p239_p2), %v1938_v2  ;;  %v1908_v14 = vld [vmem:[%s2530_s1 + $0x18] sm:$0xff] (!%p239_p2)   ;;  %v1909_v18 = vld [vmem:[%s2530_s1 + $0x20] sm:$0xff] (!%p239_p2)   ;;  %v1910_v19 = vld [vmem:[%s2530_s1 + $0x28] sm:$0xff] (!%p239_p2)  }
   0x7   : > { %1668 = vmatprep.subr.bf16.mxu0 (!%p239_p2), %v1905_v0  ;;  %v1911_v21 = vld [vmem:[%s2530_s1 + $0x30] sm:$0xff] (!%p239_p2)   ;;  %v1912_v24 = vld [vmem:[%s2530_s1 + $0x38] sm:$0xff] (!%p239_p2)   ;;  %v2060_v50 = vand.u32 (!%p239_p2), 127, %v299_v48  ;;  %v1939_v55 = vmov (!%p239_p2), 1.0|1.0   ;;  %s1940_s13 = smov (!%p239_p2), 32  }
   0x8   : > { %1669 = vmatpush3.bf16.msra.mxu0 (!%p239_p2), %v1905_v0  ;;  %s1941_s16 = smov (!%p239_p2), 64   ;;  %s1942_s21 = smov (!%p239_p2), 96  }
   0x9   : > { %1670 = vmatprep.subr.bf16.mxu0 (!%p239_p2), %v1906_v3 }
   0xc   : > { %1671 = vmatpush3.bf16.msra.mxu0 (!%p239_p2), %v1906_v3 }
   0xd   : > { %s2540_s26 = smov (!%p271_p3, %s1563_s26), 31  ;;  %1672 = vmatprep.subr.bf16.mxu0 %v1907_v13 }
   0xe   : > { %s1564_s8 = sshll.u32 %s2540_s26, 3 }
   0xf   : > { %s2006_s11 = scalar_lea.vmem %s2529_s0, %s1564_s8 }
  0x10   : > { %v286_v4 = vld [vmem:[%s2006_s11 + $0x18] sm:$0xff]  ;;  %v285_v5 = vld [vmem:[%s2006_s11 + $0x10] sm:$0xff]  ;;  %v283_v6 = vld [vmem:[%s2006_s11] sm:$0xff]  ;;  %1673 = vmatpush3.bf16.msra.mxu0 %v1907_v13 }
  0x11   : > { %311 = vperm.xlu1 %1768, %v286_v4   ;;  %v367_v7 = vadd.s32 20, %v285_v5  ;;  %v289_v8 = vld [vmem:[%s2006_s11 + $0x30] sm:$0xff]  ;;  %v365_v9 = vadd.s32 20, %v283_v6  ;;  %v284_v11 = vld [vmem:[%s2006_s11 + $0x8] sm:$0xff]  ;;  %v368_v17 = vadd.s32 20, %v286_v4  ;;  %1674 = vmatprep.subr.bf16.mxu0 %v1908_v14  ;;  %v287_v20 = vld [vmem:[%s2006_s11 + $0x20] sm:$0xff] }
  0x12   : > { %v371_v10 = vadd.s32 20, %v289_v8  ;;  %v293_v12 = vld [vmem:[%s2006_s11 + $0x50] sm:$0xff]  ;;  %v366_v15 = vadd.s32 20, %v284_v11  ;;  %v369_v22 = vadd.s32 20, %v287_v20  ;;  %v288_v23 = vld [vmem:[%s2006_s11 + $0x28] sm:$0xff]  ;;  %v290_v26 = vld [vmem:[%s2006_s11 + $0x38] sm:$0xff] }
  0x13   : > { %388 = vperm.xlu0 %1770, %v367_v7   ;;  %v375_v16 = vadd.s32 20, %v293_v12  ;;  %v370_v25 = vadd.s32 20, %v288_v23  ;;  %v292_v27 = vld [vmem:[%s2006_s11 + $0x48] sm:$0xff]  ;;  %v372_v28 = vadd.s32 20, %v290_v26  ;;  %v291_v29 = vld [vmem:[%s2006_s11 + $0x40] sm:$0xff]  ;;  %v297_v32 = vld [vmem:[%s2006_s11 + $0x70] sm:$0xff] }
  0x14   : > { %1675 = vmatpush3.bf16.msra.mxu0 %v1908_v14  ;;  %v296_v30 = vld [vmem:[%s2006_s11 + $0x68] sm:$0xff]  ;;  %v373_v31 = vadd.s32 20, %v291_v29  ;;  %v374_v33 = vadd.s32 20, %v292_v27  ;;  %v379_v34 = vadd.s32 20, %v297_v32  ;;  %v294_v35 = vld [vmem:[%s2006_s11 + $0x58] sm:$0xff]  ;;  %v295_v37 = vld [vmem:[%s2006_s11 + $0x60] sm:$0xff] }
  0x15   : > { %1769 = vset.pattern.permute.xlu1 %v1938_v2  ;;  %1676 = vmatprep.subr.bf16.mxu0 %v1909_v18  ;;  %v376_v36 = vadd.s32 20, %v294_v35  ;;  %v377_v38 = vadd.s32 20, %v295_v37  ;;  %v378_v39 = vadd.s32 20, %v296_v30  ;;  %v298_v40 = vld [vmem:[%s2006_s11 + $0x78] sm:$0xff]  ;;  %v1913_v13 = vld [vmem:[%s2531_s2] sm:$0xff]   ;;  %v1914_v14 = vld [vmem:[%s2531_s2 + $0x8] sm:$0xff]  }
  0x16   : > { %382 = vperm.xlu1 %1769, %v365_v9   ;;  %v380_v41 = vadd.s32 20, %v298_v40  ;;  %1700 = vmatprep.subr.bf16.mxu1 %v1913_v13 }
  0x17   : > { %400 = vperm.xlu0 %1770, %v371_v10   ;;  %1701 = vmatpush3.bf16.msra.mxu1 %v1913_v13 }
  0x18   : > { %1677 = vmatpush3.bf16.msra.mxu0 %v1909_v18  ;;  %1702 = vmatprep.subr.bf16.mxu1 %v1914_v14  ;;  %v1916_v18 = vld [vmem:[%s2531_s2 + $0x18] sm:$0xff]  }
  0x19   : > { %1678 = vmatprep.subr.bf16.mxu0 %v1910_v19 }
  0x1a   : > { %385 = vperm.xlu1 %1769, %v366_v15   ;;  %v1915_v15 = vld [vmem:[%s2531_s2 + $0x10] sm:$0xff]  }
  0x1b   : > { %412 = vperm.xlu0 %1770, %v375_v16   ;;  %1703 = vmatpush3.bf16.msra.mxu1 %v1914_v14  ;;  %v2113_v16 = vshrl.u32 %v299_v48, 7 }
  0x1c   : > { %1679 = vmatpush3.bf16.msra.mxu0 %v1910_v19  ;;  %1704 = vmatprep.subr.bf16.mxu1 %v1915_v15 }
  0x1d   : > { %1680 = vmatprep.subr.bf16.mxu0 %v1911_v21 }
  0x1e   : > { %391 = vperm.xlu1 %1769, %v368_v17  }
  0x1f   : > { %1778 = vset.pattern.permute.xlu0 %v1937_v1  ;;  %1705 = vmatpush3.bf16.msra.mxu1 %v1915_v15 }
  0x20   : > { %302 = vperm.xlu0 %1778, %v283_v6   ;;  %1681 = vmatpush3.bf16.msra.mxu0 %v1911_v21 }
  0x21   : > { %1682 = vmatprep.subr.bf16.mxu0 %v1912_v24  ;;  %1706 = vmatprep.subr.bf16.mxu1 %v1916_v18 }
  0x22   : > { %1771 = vset.pattern.permute.xlu1 %v1937_v1 }
  0x23   : > { %314 = vperm.xlu1 %1771, %v287_v20   ;;  %1707 = vmatpush3.bf16.msra.mxu1 %v1916_v18 }
  0x24   : > { %305 = vperm.xlu0 %1778, %v284_v11   ;;  %1683 = vmatpush3.bf16.msra.mxu0 %v1912_v24 }
  0x27   : > { %1772 = vset.pattern.permute.xlu1 %v1938_v2 }
  0x28   : > { %308 = vperm.xlu0 %1778, %v285_v5   ;;  %394 = vperm.xlu1 %1772, %v369_v22  }
  0x2c   : > { %317 = vperm.xlu0 %1778, %v288_v23   ;;  %397 = vperm.xlu1 %1772, %v370_v25  }
  0x30   : > { %320 = vperm.xlu0 %1778, %v289_v8   ;;  %1773 = vset.pattern.permute.xlu1 %v1937_v1 }
  0x31   : > { %323 = vperm.xlu1 %1773, %v290_v26  }
  0x34   : > { %329 = vperm.xlu0 %1778, %v292_v27  }
  0x35   : > { %1774 = vset.pattern.permute.xlu1 %v1938_v2 }
  0x36   : > { %403 = vperm.xlu1 %1774, %v372_v28  }
  0x38   : > { %332 = vperm.xlu0 %1778, %v293_v12  }
  0x3a   : > { %1775 = vset.pattern.permute.xlu1 %v1937_v1 }
  0x3b   : > { %326 = vperm.xlu1 %1775, %v291_v29  }
  0x3c   : > { %341 = vperm.xlu0 %1778, %v296_v30  }
  0x3f   : > { %1776 = vset.pattern.permute.xlu1 %v1938_v2 }
  0x40   : > { %344 = vperm.xlu0 %1778, %v297_v32   ;;  %406 = vperm.xlu1 %1776, %v373_v31  }
  0x44   : > { %1783 = vset.pattern.permute.xlu0 %v1938_v2  ;;  %409 = vperm.xlu1 %1776, %v374_v33   ;;  %v1917_v33 = vld [vmem:[%s2531_s2 + $0x20] sm:$0xff]  }
  0x45   : > { %424 = vperm.xlu0 %1783, %v379_v34   ;;  %1708 = vmatprep.subr.bf16.mxu1 %v1917_v33 }
  0x46   : > { %1709 = vmatpush3.bf16.msra.mxu1 %v1917_v33 }
  0x48   : > { %1777 = vset.pattern.permute.xlu1 %v1937_v1 }
  0x49   : > { %335 = vperm.xlu1 %1777, %v294_v35  }
  0x4d   : > { %1779 = vset.pattern.permute.xlu1 %v1938_v2 }
  0x4e   : > { %415 = vperm.xlu1 %1779, %v376_v36  }
  0x52   : > { %1780 = vset.pattern.permute.xlu1 %v1937_v1 }
  0x53   : > { %338 = vperm.xlu1 %1780, %v295_v37  }
  0x57   : > { %1781 = vset.pattern.permute.xlu1 %v1938_v2 }
  0x58   : > { %418 = vperm.xlu1 %1781, %v377_v38  }
  0x5c   : > { %421 = vperm.xlu1 %1781, %v378_v39  }
  0x60   : > { %1782 = vset.pattern.permute.xlu1 %v1937_v1 }
  0x61   : > { %347 = vperm.xlu1 %1782, %v298_v40  }
  0x65   : > { %1784 = vset.pattern.permute.xlu1 %v1938_v2 }
  0x66   : > { %427 = vperm.xlu1 %1784, %v380_v41  }
  0x90   : > { %v312_v42 = vpop.permute.xlu1 %311 }
  0x91   : > { %vm352_vm9 = vcmp.eq.s32.totalorder %v2060_v50, %v312_v42 }
  0x92   : > { %v389_v43 = vpop.permute.xlu0 %388 }
  0x93   : > { %vm431_vm7 = vcmp.eq.s32.totalorder %v2060_v50, %v389_v43 }
  0x95   : > { %v383_v44 = vpop.permute.xlu1 %382 }
  0x96   : > { %v401_v45 = vpop.permute.xlu0 %400  ;;  %vm429_vm1 = vcmp.eq.s32.totalorder %v2060_v50, %v383_v44 }
  0x99   : > { %v386_v46 = vpop.permute.xlu1 %385 }
  0x9a   : > { %v2057_v47 = vpop.permute.xlu0 %412  ;;  %vm430_vm2 = vcmp.eq.s32.totalorder %v2060_v50, %v386_v46 }
  0x9d   : > { %v392_v49 = vpop.permute.xlu1 %391 }
  0x9e   : > { %vm432_vm5 = vcmp.eq.s32.totalorder %v2060_v50, %v392_v49  ;;  %v1919_v49 = vld [vmem:[%s2531_s2 + $0x30] sm:$0xff]  }
  0x9f   : > { %v303_v51 = vpop.permute.xlu0 %302  ;;  %vm448_vm10 = vmor %vm352_vm9, %vm432_vm5  ;;  %vm435_vm5 = vcmp.eq.s32.totalorder %v2060_v50, %v401_v45 }
  0xa0   : > { %vm349_vm0 = vcmp.eq.s32.totalorder %v2060_v50, %v303_v51 }
  0xa1   : > { %vm445_vm4 = vmor %vm349_vm0, %vm429_vm1 }
  0xa2   : > { %v315_v52 = vpop.permute.xlu1 %314 }
  0xa3   : > { %v306_v53 = vpop.permute.xlu0 %305  ;;  %vm353_vm15 = vcmp.eq.s32.totalorder %v2060_v50, %v315_v52 }
  0xa4   : > { %vm350_vm3 = vcmp.eq.s32.totalorder %v2060_v50, %v306_v53 }
  0xa5   : > { %vm446_vm6 = vmor %vm350_vm3, %vm430_vm2 }
  0xa6   : > { %vm1591_vm8 = vmpackc.low %vm446_vm6, %vm445_vm4 }
  0xa7   : > { %v309_v54 = vpop.permute.xlu0 %308  ;;  %1684 = vmatprep.mubr.msk.bf16.mxu0 %vm1591_vm8, %v1939_v55  ;;  %v395_v56 = vpop.permute.xlu1 %394 }
  0xa8   : > { %vm351_vm11 = vcmp.eq.s32.totalorder %v2060_v50, %v309_v54  ;;  %vm433_vm13 = vcmp.eq.s32.totalorder %v2060_v50, %v395_v56 }
  0xa9   : > { %vm447_vm12 = vmor %vm351_vm11, %vm431_vm7 }
  0xaa   : > { %vm1593_vm14 = vmpackc.low %vm448_vm10, %vm447_vm12 }
  0xab   : > { %v318_v57 = vpop.permute.xlu0 %317  ;;  %1685 = vmatmul.mubr.msk.bf16.vlgmr.msra.gmra.mrb[0].mxu0 %vm1593_vm14, %v1939_v55  ;;  %v398_v58 = vpop.permute.xlu1 %397  ;;  %vm449_vm0 = vmor %vm353_vm15, %vm433_vm13 }
  0xac   : > { %vm354_vm1 = vcmp.eq.s32.totalorder %v2060_v50, %v318_v57  ;;  %vm434_vm2 = vcmp.eq.s32.totalorder %v2060_v50, %v398_v58  ;;  %v1920_v57 = vld [vmem:[%s2531_s2 + $0x38] sm:$0xff]  }
  0xad   : > { %vm450_vm3 = vmor %vm354_vm1, %vm434_vm2 }
  0xae   : > { %vm1595_vm4 = vmpackc.low %vm450_vm3, %vm449_vm0 }
  0xaf   : > { %1688 = vmatprep.mubr.msk.bf16.mxu0 %vm1595_vm4, %v1939_v55  ;;  %v321_v59 = vpop.permute.xlu0 %320  ;;  %vm439_vm4 = vcmp.eq.s32.totalorder %v2060_v50, %v2057_v47  ;;  %v1918_v47 = vld [vmem:[%s2531_s2 + $0x28] sm:$0xff]  }
  0xb0   : > { %v324_v60 = vpop.permute.xlu1 %323  ;;  %vm355_vm6 = vcmp.eq.s32.totalorder %v2060_v50, %v321_v59  ;;  %1710 = vmatprep.subr.bf16.mxu1 %v1918_v47 }
  0xb1   : > { %vm451_vm7 = vmor %vm355_vm6, %vm435_vm5  ;;  %vm356_vm8 = vcmp.eq.s32.totalorder %v2060_v50, %v324_v60  ;;  %1711 = vmatpush3.bf16.msra.mxu1 %v1918_v47 }
  0xb2   : > { %1712 = vmatprep.subr.bf16.mxu1 %v1919_v49 }
  0xb3   : > { %v330_v0 = vpop.permute.xlu0 %329 }
  0xb4   : > { %vm358_vm14 = vcmp.eq.s32.totalorder %v2060_v50, %v330_v0 }
  0xb5   : > { %v404_v61 = vpop.permute.xlu1 %403  ;;  %1713 = vmatpush3.bf16.msra.mxu1 %v1919_v49 }
  0xb6   : > { %vm436_vm9 = vcmp.eq.s32.totalorder %v2060_v50, %v404_v61  ;;  %1714 = vmatprep.subr.bf16.mxu1 %v1920_v57 }
  0xb7   : > { %vm452_vm10 = vmor %vm356_vm8, %vm436_vm9  ;;  %v333_v2 = vpop.permute.xlu0 %332 }
  0xb8   : > { %vm1597_vm11 = vmpackc.low %vm452_vm10, %vm451_vm7  ;;  %vm359_vm3 = vcmp.eq.s32.totalorder %v2060_v50, %v333_v2 }
  0xb9   : > { %1689 = vmatmul.mubr.msk.bf16.gmra.mrb[4].mxu0 %vm1597_vm11, %v1939_v55  ;;  %vm455_vm5 = vmor %vm359_vm3, %vm439_vm4  ;;  %1715 = vmatpush3.bf16.msra.mxu1 %v1920_v57 }
  0xba   : > { %v327_v62 = vpop.permute.xlu1 %326 }
  0xbb   : > { %vm357_vm13 = vcmp.eq.s32.totalorder %v2060_v50, %v327_v62  ;;  %v342_v6 = vpop.permute.xlu0 %341 }
  0xbf   : > { %v407_v63 = vpop.permute.xlu1 %406  ;;  %v345_v8 = vpop.permute.xlu0 %344 }
  0xc0   : > { %vm437_vm12 = vcmp.eq.s32.totalorder %v2060_v50, %v407_v63 }
  0xc1   : > { %vm453_vm15 = vmor %vm357_vm13, %vm437_vm12  ;;  %vm362_vm12 = vcmp.eq.s32.totalorder %v2060_v50, %v342_v6 }
  0xc3   : > { %v410_v1 = vpop.permute.xlu1 %409 }
  0xc4   : > { %vm438_vm0 = vcmp.eq.s32.totalorder %v2060_v50, %v410_v1  ;;  %v425_v10 = vpop.permute.xlu0 %424 }
  0xc5   : > { %vm454_vm1 = vmor %vm358_vm14, %vm438_vm0 }
  0xc6   : > { %vm1599_vm2 = vmpackc.low %vm454_vm1, %vm453_vm15  ;;  %vm443_vm1 = vcmp.eq.s32.totalorder %v2060_v50, %v425_v10 }
  0xc7   : > { %1692 = vmatprep.mubr.msk.bf16.mxu0 %vm1599_vm2, %v1939_v55  ;;  %vm363_vm2 = vcmp.eq.s32.totalorder %v2060_v50, %v345_v8 }
  0xc8   : > { %v336_v3 = vpop.permute.xlu1 %335  ;;  %vm459_vm3 = vmor %vm363_vm2, %vm443_vm1  ;;  %vm1390_vm1 = vcmask 1042434   ;;  %vm1392_vm2 = vcmask 1043459  }
  0xc9   : > { %vm360_vm6 = vcmp.eq.s32.totalorder %v2060_v50, %v336_v3 }
  0xcd   : > { %v416_v4 = vpop.permute.xlu1 %415 }
  0xce   : > { %vm440_vm7 = vcmp.eq.s32.totalorder %v2060_v50, %v416_v4 }
  0xcf   : > { %vm456_vm8 = vmor %vm360_vm6, %vm440_vm7 }
  0xd0   : > { %vm1601_vm9 = vmpackc.low %vm456_vm8, %vm455_vm5  ;;  %vm680_vm8 = vcmp.lt.s32.totalorder %v2113_v16, 7 }
  0xd1   : > { %1693 = vmatmul.mubr.msk.bf16.gmra.mrb[8].mxu0 %vm1601_vm9, %v1939_v55  ;;  %vm713_vm9 = vcmp.lt.s32.totalorder %v2113_v16, 6 }
  0xd2   : > { %v339_v5 = vpop.permute.xlu1 %338 }
  0xd3   : > { %vm361_vm11 = vcmp.eq.s32.totalorder %v2060_v50, %v339_v5 }
  0xd7   : > { %v419_v7 = vpop.permute.xlu1 %418 }
  0xd8   : > { %vm441_vm10 = vcmp.eq.s32.totalorder %v2060_v50, %v419_v7 }
  0xd9   : > { %vm457_vm13 = vmor %vm361_vm11, %vm441_vm10  ;;  %vm746_vm10 = vcmp.lt.s32.totalorder %v2113_v16, 5  ;;  %vm955_vm11 = vcmask 261120  }
  0xdb   : > { %v422_v9 = vpop.permute.xlu1 %421 }
  0xdc   : > { %vm442_vm14 = vcmp.eq.s32.totalorder %v2060_v50, %v422_v9 }
  0xdd   : > { %vm458_vm15 = vmor %vm362_vm12, %vm442_vm14  ;;  %vm972_vm12 = vcmask 523264   ;;  %vm1944_vm14 = vmmov 0  }
  0xde   : > { %vm1603_vm0 = vmpackc.low %vm458_vm15, %vm457_vm13  ;;  %vm989_vm13 = vcmask 785408  }
  0xdf   : > { %1696 = vmatprep.mubr.msk.bf16.mxu0 %vm1603_vm0, %v1939_v55  ;;  %vm1388_vm0 = vcmask 1041409  }
  0xe0   : > { %v348_v11 = vpop.permute.xlu1 %347 }
  0xe1   : > { %vm364_vm4 = vcmp.eq.s32.totalorder %v2060_v50, %v348_v11 }
  0xe5   : > { %v428_v12 = vpop.permute.xlu1 %427 }
  0xe6   : > { %vm444_vm5 = vcmp.eq.s32.totalorder %v2060_v50, %v428_v12 }
  0xe7   : > { %vm460_vm6 = vmor %vm364_vm4, %vm444_vm5  ;;  %vm1396_vm4 = vcmask 1045509   ;;  %vm1398_vm5 = vcmask 1046534  }
  0xe8   : > { %vm1605_vm7 = vmpackc.low %vm460_vm6, %vm459_vm3  ;;  %vm1394_vm3 = vcmask 1044484   ;;  %vm1400_vm6 = vcmask 1047559  }
  0xe9   : > { %1697 = vmatmul.mubr.msk.bf16.gmra.mrb[12].mxu0 %vm1605_vm7, %v1939_v55 }
 0x17e   : > { %v2115_v17 = vpop.f32.mrb[0].mxu0 }
 0x17f   : > { %v2120_v19 = vpop.f32.mrb[1].mxu0  ;;  %v664_v20 = vrot.slane %v2115_v17, 1  ;;  %v699_v21 = vrot.slane %v2115_v17, 2  ;;  %v732_v22 = vrot.slane %v2115_v17, 3 }
 0x180   : > { %v2127_v23 = vpop.f32.mrb[2].mxu0  ;;  %v662_v24 = vrot.slane %v2120_v19, 1  ;;  %v697_v29 = vrot.slane %v2120_v19, 2  ;;  %v730_v34 = vrot.slane %v2120_v19, 3 }
 0x181   : > { %v665_v25 = vrot.slane %v2127_v23, 1  ;;  %v700_v26 = vrot.slane %v2127_v23, 2  ;;  %v733_v27 = vrot.slane %v2127_v23, 3  ;;  %v2134_v28 = vpop.f32.mrb[3].mxu0 }
 0x182   : > { %v663_v30 = vrot.slane %v2134_v28, 1  ;;  %v698_v31 = vrot.slane %v2134_v28, 2  ;;  %v731_v32 = vrot.slane %v2134_v28, 3 }
 0x183   : > { %v693_v35 = vsel %vm680_vm8, %v664_v20, %v665_v25  ;;  %v2148_v36 = vsel %vm713_vm9, %v699_v21, %v700_v26  ;;  %v2152_v37 = vsel %vm746_vm10, %v732_v22, %v733_v27 }
 0x184   : > { %v694_v38 = vsel %vm680_vm8, %v663_v30, %v664_v20  ;;  %v695_v39 = vsel %vm680_vm8, %v662_v24, %v663_v30  ;;  %v727_v40 = vsel %vm713_vm9, %v698_v31, %v699_v21  ;;  %v728_v41 = vsel %vm713_vm9, %v697_v29, %v698_v31 }
 0x185   : > { %v1785_v42 = vpack.i.bf16 %v694_v38, %v695_v39  ;;  %v1790_v43 = vpack.i.bf16 %v727_v40, %v728_v41  ;;  %v760_v44 = vsel %vm746_vm10, %v731_v32, %v732_v22  ;;  %v761_v45 = vsel %vm746_vm10, %v730_v34, %v731_v32 }
 0x186   : > { %v1795_v46 = vpack.i.bf16 %v760_v44, %v761_v45 }
 0x187   : > { %1786 = vrot.lane.b32.xlu1 %v1785_v42, %s1940_s13 }
 0x18b   : > { %1791 = vrot.lane.b32.xlu1 %v1790_v43, %s1941_s16 }
 0x18c   : > { %v2177_v48 = vpop.f32.mrb[4].mxu0 }
 0x18d   : > { %v668_v50 = vrot.slane %v2177_v48, 1  ;;  %v2183_v51 = vpop.f32.mrb[5].mxu0  ;;  %v703_v52 = vrot.slane %v2177_v48, 2  ;;  %v736_v58 = vrot.slane %v2177_v48, 3 }
 0x18e   : > { %v666_v53 = vrot.slane %v2183_v51, 1  ;;  %v701_v54 = vrot.slane %v2183_v51, 2  ;;  %v734_v55 = vrot.slane %v2183_v51, 3  ;;  %v2189_v56 = vpop.f32.mrb[6].mxu0 }
 0x18f   : > { %v669_v59 = vrot.slane %v2189_v56, 1  ;;  %v704_v60 = vrot.slane %v2189_v56, 2  ;;  %v737_v61 = vrot.slane %v2189_v56, 3  ;;  %1796 = vrot.lane.b32.xlu1 %v1795_v46, %s1942_s21  ;;  %v2199_v62 = vpop.f32.mrb[7].mxu0 }
 0x190   : > { %v667_v63 = vrot.slane %v2199_v62, 1  ;;  %v702_v0 = vrot.slane %v2199_v62, 2  ;;  %v735_v1 = vrot.slane %v2199_v62, 3  ;;  %v692_v2 = vsel %vm680_vm8, %v665_v25, %v666_v53 }
 0x191   : > { %v1800_v3 = vpack.i.bf16 %v692_v2, %v693_v35  ;;  %v725_v4 = vsel %vm713_vm9, %v700_v26, %v701_v54  ;;  %v758_v5 = vsel %vm746_vm10, %v733_v27, %v734_v55  ;;  %v689_v6 = vsel %vm680_vm8, %v668_v50, %v669_v59 }
 0x192   : > { %v690_v7 = vsel %vm680_vm8, %v667_v63, %v668_v50  ;;  %v691_v8 = vsel %vm680_vm8, %v666_v53, %v667_v63  ;;  %v1805_v9 = vpack.i.bf16 %v725_v4, %v2148_v36  ;;  %v723_v10 = vsel %vm713_vm9, %v702_v0, %v703_v52 }
 0x193   : > { %1801 = vrot.lane.b32.xlu0 %v1800_v3, %s1940_s13  ;;  %v1815_v11 = vpack.i.bf16 %v690_v7, %v691_v8  ;;  %v724_v12 = vsel %vm713_vm9, %v701_v54, %v702_v0  ;;  %v1810_v13 = vpack.i.bf16 %v758_v5, %v2152_v37  ;;  %v756_v14 = vsel %vm746_vm10, %v735_v1, %v736_v58 }
 0x194   : > { %v1820_v15 = vpack.i.bf16 %v723_v10, %v724_v12  ;;  %v757_v18 = vsel %vm746_vm10, %v734_v55, %v735_v1  ;;  %v722_v20 = vsel %vm713_vm9, %v703_v52, %v704_v60  ;;  %v755_v21 = vsel %vm746_vm10, %v736_v58, %v737_v61 }
 0x195   : > { %1816 = vrot.lane.b32.xlu1 %v1815_v11, %s1940_s13  ;;  %v1825_v22 = vpack.i.bf16 %v756_v14, %v757_v18 }
 0x197   : > { %1806 = vrot.lane.b32.xlu0 %v1805_v9, %s1941_s16 }
 0x199   : > { %1821 = vrot.lane.b32.xlu1 %v1820_v15, %s1941_s16 }
 0x19b   : > { %1811 = vrot.lane.b32.xlu0 %v1810_v13, %s1942_s21 }
 0x19d   : > { %1826 = vrot.lane.b32.xlu1 %v1825_v22, %s1942_s21 }
 0x1a4   : > { %v2236_v25 = vpop.f32.mrb[8].mxu0 }
 0x1a5   : > { %v672_v26 = vrot.slane %v2236_v25, 1  ;;  %v2239_v27 = vpop.f32.mrb[9].mxu0  ;;  %v707_v30 = vrot.slane %v2236_v25, 2  ;;  %v740_v36 = vrot.slane %v2236_v25, 3 }
 0x1a6   : > { %v670_v31 = vrot.slane %v2239_v27, 1  ;;  %v705_v32 = vrot.slane %v2239_v27, 2  ;;  %v738_v33 = vrot.slane %v2239_v27, 3  ;;  %v2245_v35 = vpop.f32.mrb[10].mxu0 }
 0x1a7   : > { %v673_v37 = vrot.slane %v2245_v35, 1  ;;  %v708_v38 = vrot.slane %v2245_v35, 2  ;;  %v741_v39 = vrot.slane %v2245_v35, 3  ;;  %v2251_v40 = vpop.f32.mrb[11].mxu0 }
 0x1a8   : > { %v671_v41 = vrot.slane %v2251_v40, 1  ;;  %v706_v42 = vrot.slane %v2251_v40, 2  ;;  %v739_v43 = vrot.slane %v2251_v40, 3  ;;  %v688_v44 = vsel %vm680_vm8, %v669_v59, %v670_v31 }
 0x1a9   : > { %v1830_v45 = vpack.i.bf16 %v688_v44, %v689_v6  ;;  %v721_v46 = vsel %vm713_vm9, %v704_v60, %v705_v32  ;;  %v754_v47 = vsel %vm746_vm10, %v737_v61, %v738_v33  ;;  %v685_v49 = vsel %vm680_vm8, %v672_v26, %v673_v37 }
 0x1aa   : > { %v686_v50 = vsel %vm680_vm8, %v671_v41, %v672_v26  ;;  %v687_v52 = vsel %vm680_vm8, %v670_v31, %v671_v41  ;;  %v1835_v53 = vpack.i.bf16 %v721_v46, %v722_v20  ;;  %v719_v54 = vsel %vm713_vm9, %v706_v42, %v707_v30 }
 0x1ab   : > { %1831 = vrot.lane.b32.xlu0 %v1830_v45, %s1940_s13  ;;  %v1845_v55 = vpack.i.bf16 %v686_v50, %v687_v52  ;;  %v720_v57 = vsel %vm713_vm9, %v705_v32, %v706_v42  ;;  %v1840_v58 = vpack.i.bf16 %v754_v47, %v755_v21  ;;  %v752_v59 = vsel %vm746_vm10, %v739_v43, %v740_v36 }
 0x1ac   : > { %v1850_v60 = vpack.i.bf16 %v719_v54, %v720_v57  ;;  %v753_v61 = vsel %vm746_vm10, %v738_v33, %v739_v43  ;;  %v718_v63 = vsel %vm713_vm9, %v707_v30, %v708_v38  ;;  %v751_v0 = vsel %vm746_vm10, %v740_v36, %v741_v39 }
 0x1ad   : > { %1846 = vrot.lane.b32.xlu1 %v1845_v55, %s1940_s13  ;;  %v1855_v1 = vpack.i.bf16 %v752_v59, %v753_v61 }
 0x1af   : > { %1836 = vrot.lane.b32.xlu0 %v1835_v53, %s1941_s16 }
 0x1b1   : > { %1851 = vrot.lane.b32.xlu1 %v1850_v60, %s1941_s16 }
 0x1b3   : > { %1841 = vrot.lane.b32.xlu0 %v1840_v58, %s1942_s21 }
 0x1b5   : > { %1856 = vrot.lane.b32.xlu1 %v1855_v1, %s1942_s21 }
 0x1bc   : > { %v2286_v2 = vpop.f32.mrb[12].mxu0 }
 0x1bd   : > { %v676_v3 = vrot.slane %v2286_v2, 1  ;;  %v2289_v4 = vpop.f32.mrb[13].mxu0  ;;  %v711_v5 = vrot.slane %v2286_v2, 2  ;;  %v744_v10 = vrot.slane %v2286_v2, 3 }
 0x1be   : > { %v674_v6 = vrot.slane %v2289_v4, 1  ;;  %v709_v7 = vrot.slane %v2289_v4, 2  ;;  %v742_v8 = vrot.slane %v2289_v4, 3  ;;  %v2295_v9 = vpop.f32.mrb[14].mxu0 }
 0x1bf   : > { %v677_v11 = vrot.slane %v2295_v9, 1  ;;  %v712_v12 = vrot.slane %v2295_v9, 2  ;;  %v745_v13 = vrot.slane %v2295_v9, 3  ;;  %v2301_v14 = vpop.f32.mrb[15].mxu0 }
 0x1c0   : > { %v675_v15 = vrot.slane %v2301_v14, 1  ;;  %v710_v18 = vrot.slane %v2301_v14, 2  ;;  %v743_v20 = vrot.slane %v2301_v14, 3  ;;  %v684_v21 = vsel %vm680_vm8, %v673_v37, %v674_v6 }
 0x1c1   : > { %v1860_v22 = vpack.i.bf16 %v684_v21, %v685_v49  ;;  %v717_v26 = vsel %vm713_vm9, %v708_v38, %v709_v7  ;;  %v750_v30 = vsel %vm746_vm10, %v741_v39, %v742_v8  ;;  %v681_v31 = vsel %vm680_vm8, %v676_v3, %v677_v11 }
 0x1c2   : > { %v682_v32 = vsel %vm680_vm8, %v675_v15, %v676_v3  ;;  %v683_v33 = vsel %vm680_vm8, %v674_v6, %v675_v15  ;;  %v1865_v36 = vpack.i.bf16 %v717_v26, %v718_v63  ;;  %v715_v37 = vsel %vm713_vm9, %v710_v18, %v711_v5 }
 0x1c3   : > { %1861 = vrot.lane.b32.xlu0 %v1860_v22, %s1940_s13  ;;  %v1885_v41 = vpack.i.bf16 %v682_v32, %v683_v33  ;;  %v716_v38 = vsel %vm713_vm9, %v709_v7, %v710_v18  ;;  %v1870_v39 = vpack.i.bf16 %v750_v30, %v751_v0  ;;  %v748_v42 = vsel %vm746_vm10, %v743_v20, %v744_v10 }
 0x1c4   : > { %v1890_v43 = vpack.i.bf16 %v715_v37, %v716_v38  ;;  %v749_v44 = vsel %vm746_vm10, %v742_v8, %v743_v20  ;;  %v696_v45 = vsel %vm680_vm8, %v677_v11, %v662_v24  ;;  %v714_v46 = vsel %vm713_vm9, %v711_v5, %v712_v12 }
 0x1c5   : > { %1886 = vrot.lane.b32.xlu1 %v1885_v41, %s1940_s13  ;;  %v1895_v47 = vpack.i.bf16 %v748_v42, %v749_v44  ;;  %v1875_v49 = vpack.i.bf16 %v696_v45, %v681_v31  ;;  %v729_v50 = vsel %vm713_vm9, %v712_v12, %v697_v29  ;;  %v747_v52 = vsel %vm746_vm10, %v744_v10, %v745_v13 }
 0x1c6   : > { %v1880_v53 = vpack.i.bf16 %v729_v50, %v714_v46  ;;  %v762_v24 = vsel %vm746_vm10, %v745_v13, %v730_v34 }
 0x1c7   : > { %1866 = vrot.lane.b32.xlu0 %v1865_v36, %s1941_s16  ;;  %v1900_v54 = vpack.i.bf16 %v762_v24, %v747_v52 }
 0x1c9   : > { %1891 = vrot.lane.b32.xlu1 %v1890_v43, %s1941_s16 }
 0x1cb   : > { %1871 = vrot.lane.b32.xlu0 %v1870_v39, %s1942_s21 }
 0x1cd   : > { %1896 = vrot.lane.b32.xlu1 %v1895_v47, %s1942_s21 }
 0x1cf   : > { %1876 = vrot.lane.b32.xlu0 %v1875_v49, %s1940_s13 }
 0x1d3   : > { %1881 = vrot.lane.b32.xlu0 %v1880_v53, %s1941_s16 }
 0x1d7   : > { %1901 = vrot.lane.b32.xlu0 %v1900_v54, %s1942_s21  ;;  %s1565_s21 = sshll.u32 %s1558_s25, 1 }
 0x1d8   : > { %p277_p4 = scmp.lt.s32.totalorder %s1565_s21, 3 }
 0x1da   : > { %s2542_s21 = smov (!%p277_p4, %s1565_s21), 3 }
 0x1db   : > { %s1566_s22 = sshll.u32 %s2542_s21, 3 }
 0x1dc   : > { %s280_s29 = scalar_lea.vmem %s2536_s7, %s1566_s22 }
 0x1f9   : > { %v1787_v29 = vpop.permute.xlu1 %1786 }
 0x1fa   : > { %v1789_v57 = vunpack.i.h.bf16 %v1787_v29  ;;  %v1788_v58 = vunpack.i.l.bf16 %v1787_v29 }
 0x1fc   : > { %v956_v0 = vsel %vm955_vm11, %v2120_v19, %v1788_v58  ;;  %v957_v1 = vsel %vm955_vm11, %v2134_v28, %v1789_v57 }
 0x1fd   : > { %v1792_v55 = vpop.permute.xlu1 %1791 }
 0x1fe   : > { %v1794_v34 = vunpack.i.h.bf16 %v1792_v55  ;;  %v1793_v59 = vunpack.i.l.bf16 %v1792_v55 }
 0x200   : > { %v973_v3 = vsel %vm972_vm12, %v956_v0, %v1793_v59  ;;  %v974_v5 = vsel %vm972_vm12, %v957_v1, %v1794_v34 }
 0x201   : > { %v1797_v60 = vpop.permute.xlu1 %1796 }
 0x202   : > { %v1799_v61 = vunpack.i.h.bf16 %v1797_v60  ;;  %v1798_v63 = vunpack.i.l.bf16 %v1797_v60 }
 0x204   : > { %v990_v6 = vsel %vm989_vm13, %v973_v3, %v1798_v63  ;;  %v991_v7 = vsel %vm989_vm13, %v974_v5, %v1799_v61 }
 0x205   : > { %v1802_v8 = vpop.permute.xlu0 %1801  ;;  %v1006_v10 = vpack.c.bf16 %v991_v7, %v990_v6 }
 0x206   : > { %v1804_v13 = vunpack.i.h.bf16 %v1802_v8  ;;  %v1803_v15 = vunpack.i.l.bf16 %v1802_v8 }
 0x207   : > { %v1817_v11 = vpop.permute.xlu1 %1816  ;;  %1716 = vmatprep.mubr.bf16.mxu1 %v1006_v10 }
 0x208   : > { %v1819_v18 = vunpack.i.h.bf16 %v1817_v11  ;;  %v1818_v19 = vunpack.i.l.bf16 %v1817_v11  ;;  %v959_v31 = vsel %vm955_vm11, %v2127_v23, %v1804_v13  ;;  %v958_v32 = vsel %vm955_vm11, %v2115_v17, %v1803_v15 }
 0x209   : > { %v1807_v12 = vpop.permute.xlu0 %1806 }
 0x20a   : > { %v1809_v20 = vunpack.i.h.bf16 %v1807_v12  ;;  %v1808_v21 = vunpack.i.l.bf16 %v1807_v12  ;;  %v961_v37 = vsel %vm955_vm11, %v2199_v62, %v1819_v18  ;;  %v960_v41 = vsel %vm955_vm11, %v2183_v51, %v1818_v19 }
 0x20b   : > { %v1822_v28 = vpop.permute.xlu1 %1821 }
 0x20c   : > { %v1824_v22 = vunpack.i.h.bf16 %v1822_v28  ;;  %v1823_v26 = vunpack.i.l.bf16 %v1822_v28  ;;  %v975_v38 = vsel %vm972_vm12, %v958_v32, %v1808_v21  ;;  %v976_v39 = vsel %vm972_vm12, %v959_v31, %v1809_v20 }
 0x20d   : > { %v1812_v30 = vpop.permute.xlu0 %1811 }
 0x20e   : > { %v1814_v33 = vunpack.i.h.bf16 %v1812_v30  ;;  %v1813_v36 = vunpack.i.l.bf16 %v1812_v30  ;;  %v977_v17 = vsel %vm972_vm12, %v960_v41, %v1823_v26  ;;  %v978_v46 = vsel %vm972_vm12, %v961_v37, %v1824_v22 }
 0x20f   : > { %v1827_v42 = vpop.permute.xlu1 %1826 }
 0x210   : > { %v1829_v43 = vunpack.i.h.bf16 %v1827_v42  ;;  %v1828_v44 = vunpack.i.l.bf16 %v1827_v42  ;;  %v992_v23 = vsel %vm989_vm13, %v975_v38, %v1813_v36  ;;  %v993_v45 = vsel %vm989_vm13, %v976_v39, %v1814_v33 }
 0x211   : > { %v1007_v47 = vpack.c.bf16 %v993_v45, %v992_v23 }
 0x212   : > { %v994_v62 = vsel %vm989_vm13, %v977_v17, %v1828_v44  ;;  %v995_v51 = vsel %vm989_vm13, %v978_v46, %v1829_v43 }
 0x213   : > { %1717 = vmatmul.mubr.bf16.vlgmr.msra.gmra.mrb[0].mxu1 %v1007_v47  ;;  %v1008_v49 = vpack.c.bf16 %v995_v51, %v994_v62 }
 0x215   : > { %1720 = vmatprep.mubr.bf16.mxu1 %v1008_v49 }
 0x21d   : > { %v1832_v50 = vpop.permute.xlu0 %1831 }
 0x21e   : > { %v1834_v24 = vunpack.i.h.bf16 %v1832_v50  ;;  %v1833_v54 = vunpack.i.l.bf16 %v1832_v50 }
 0x21f   : > { %v1847_v52 = vpop.permute.xlu1 %1846 }
 0x220   : > { %v1849_v29 = vunpack.i.h.bf16 %v1847_v52  ;;  %v1848_v55 = vunpack.i.l.bf16 %v1847_v52  ;;  %v963_v63 = vsel %vm955_vm11, %v2189_v56, %v1834_v24  ;;  %v962_v0 = vsel %vm955_vm11, %v2177_v48, %v1833_v54 }
 0x221   : > { %v1837_v53 = vpop.permute.xlu0 %1836 }
 0x222   : > { %v1839_v57 = vunpack.i.h.bf16 %v1837_v53  ;;  %v1838_v58 = vunpack.i.l.bf16 %v1837_v53  ;;  %v965_v5 = vsel %vm955_vm11, %v2251_v40, %v1849_v29  ;;  %v964_v6 = vsel %vm955_vm11, %v2239_v27, %v1848_v55 }
 0x223   : > { %v1852_v34 = vpop.permute.xlu1 %1851 }
 0x224   : > { %v1854_v59 = vunpack.i.h.bf16 %v1852_v34  ;;  %v1853_v60 = vunpack.i.l.bf16 %v1852_v34  ;;  %v979_v7 = vsel %vm972_vm12, %v962_v0, %v1838_v58  ;;  %v980_v8 = vsel %vm972_vm12, %v963_v63, %v1839_v57 }
 0x225   : > { %v1842_v61 = vpop.permute.xlu0 %1841 }
 0x226   : > { %v1844_v1 = vunpack.i.h.bf16 %v1842_v61  ;;  %v1843_v3 = vunpack.i.l.bf16 %v1842_v61  ;;  %v981_v48 = vsel %vm972_vm12, %v964_v6, %v1853_v60  ;;  %v982_v15 = vsel %vm972_vm12, %v965_v5, %v1854_v59 }
 0x227   : > { %v1857_v10 = vpop.permute.xlu1 %1856 }
 0x228   : > { %v1859_v11 = vunpack.i.h.bf16 %v1857_v10  ;;  %v1858_v12 = vunpack.i.l.bf16 %v1857_v10  ;;  %v996_v56 = vsel %vm989_vm13, %v979_v7, %v1843_v3  ;;  %v997_v13 = vsel %vm989_vm13, %v980_v8, %v1844_v1  ;;  %v1921_v7 = vld [vmem:[%s2534_s5] sm:$0xff]   ;;  %v1923_v8 = vld [vmem:[%s2534_s5 + $0x10] sm:$0xff]   ;;  %v1924_v10 = vld [vmem:[%s2534_s5 + $0x18] sm:$0xff]  }
 0x229   : > { %v1009_v18 = vpack.c.bf16 %v997_v13, %v996_v56  ;;  %v1927_v56 = vld [vmem:[%s2534_s5 + $0x30] sm:$0xff]   ;;  %v1928_v13 = vld [vmem:[%s2534_s5 + $0x38] sm:$0xff]  }
 0x22a   : > { %v998_v40 = vsel %vm989_vm13, %v981_v48, %v1858_v12  ;;  %v999_v27 = vsel %vm989_vm13, %v982_v15, %v1859_v11  ;;  %v1925_v11 = vld [vmem:[%s2534_s5 + $0x20] sm:$0xff]   ;;  %v1926_v12 = vld [vmem:[%s2534_s5 + $0x28] sm:$0xff]  }
 0x22b   : > { %1721 = vmatmul.mubr.bf16.gmra.mrb[4].mxu1 %v1009_v18  ;;  %v1010_v19 = vpack.c.bf16 %v999_v27, %v998_v40  ;;  %v1198_v48 = vld [vmem:[%s2533_s4] sm:$0x1]  ;;  %v1202_v18 = vsub.s32 0, %v2113_v16 }
 0x22c   : > { %v1199_v15 = vsub.s32 8, %v1198_v48  ;;  %v2446_v40 = vld [vmem:[%s2532_s3] ss:$0 sm:$0xff] }
 0x22d   : > { %1724 = vmatprep.mubr.bf16.mxu1 %v1010_v19 }
 0x22e   : > { %v1203_v27 = vrot.slane %v1199_v15, %v1202_v18 }
 0x230   : > { %vm2450_vm15 = vcmp.le.s32.totalorder %v2113_v16, %v1203_v27 }
 0x235   : > { %v1862_v20 = vpop.permute.xlu0 %1861 }
 0x236   : > { %v1864_v22 = vunpack.i.h.bf16 %v1862_v20  ;;  %v1863_v26 = vunpack.i.l.bf16 %v1862_v20 }
 0x237   : > { %v1887_v21 = vpop.permute.xlu1 %1886 }
 0x238   : > { %v1889_v30 = vunpack.i.h.bf16 %v1887_v21  ;;  %v1888_v31 = vunpack.i.l.bf16 %v1887_v21  ;;  %v967_v39 = vsel %vm955_vm11, %v2245_v35, %v1864_v22  ;;  %v966_v42 = vsel %vm955_vm11, %v2236_v25, %v1863_v26 }
 0x239   : > { %v1867_v28 = vpop.permute.xlu0 %1866 }
 0x23a   : > { %v1869_v32 = vunpack.i.h.bf16 %v1867_v28  ;;  %v1868_v33 = vunpack.i.l.bf16 %v1867_v28  ;;  %v969_v23 = vsel %vm955_vm11, %v2301_v14, %v1889_v30  ;;  %v968_v45 = vsel %vm955_vm11, %v2289_v4, %v1888_v31 }
 0x23b   : > { %v1892_v36 = vpop.permute.xlu1 %1891 }
 0x23c   : > { %v1894_v37 = vunpack.i.h.bf16 %v1892_v36  ;;  %v1893_v41 = vunpack.i.l.bf16 %v1892_v36  ;;  %v983_v17 = vsel %vm972_vm12, %v966_v42, %v1868_v33  ;;  %v984_v46 = vsel %vm972_vm12, %v967_v39, %v1869_v32 }
 0x23d   : > { %v1872_v38 = vpop.permute.xlu0 %1871 }
 0x23e   : > { %v1874_v43 = vunpack.i.h.bf16 %v1872_v38  ;;  %v1873_v44 = vunpack.i.l.bf16 %v1872_v38  ;;  %v985_v25 = vsel %vm972_vm12, %v968_v45, %v1893_v41  ;;  %v986_v50 = vsel %vm972_vm12, %v969_v23, %v1894_v37 }
 0x23f   : > { %v1897_v47 = vpop.permute.xlu1 %1896 }
 0x240   : > { %v1899_v62 = vunpack.i.h.bf16 %v1897_v47  ;;  %v1898_v51 = vunpack.i.l.bf16 %v1897_v47  ;;  %v1000_v35 = vsel %vm989_vm13, %v983_v17, %v1873_v44  ;;  %v1001_v49 = vsel %vm989_vm13, %v984_v46, %v1874_v43 }
 0x241   : > { %v1877_v52 = vpop.permute.xlu0 %1876  ;;  %v1011_v14 = vpack.c.bf16 %v1001_v49, %v1000_v35 }
 0x242   : > { %v1002_v53 = vsel %vm989_vm13, %v985_v25, %v1898_v51  ;;  %v1003_v4 = vsel %vm989_vm13, %v986_v50, %v1899_v62  ;;  %v1879_v29 = vunpack.i.h.bf16 %v1877_v52  ;;  %v1878_v55 = vunpack.i.l.bf16 %v1877_v52 }
 0x243   : > { %1725 = vmatmul.mubr.bf16.gmra.mrb[8].mxu1 %v1011_v14  ;;  %v1012_v24 = vpack.c.bf16 %v1003_v4, %v1002_v53 }
 0x244   : > { %v971_v59 = vsel %vm955_vm11, %v2295_v9, %v1879_v29  ;;  %v970_v60 = vsel %vm955_vm11, %v2286_v2, %v1878_v55  ;;  %v1943_v9 = vmov 0.0   ;;  %v1922_v2 = vld [vmem:[%s2534_s5 + $0x8] sm:$0xff]  }
 0x245   : > { %v1882_v54 = vpop.permute.xlu0 %1881  ;;  %1728 = vmatprep.mubr.bf16.mxu1 %v1012_v24  ;;  %1732 = vmatprep.subr.bf16.mxu0 %v1943_v9 }
 0x246   : > { %v1884_v57 = vunpack.i.h.bf16 %v1882_v54  ;;  %v1883_v58 = vunpack.i.l.bf16 %v1882_v54  ;;  %1733 = vmatpush3.bf16.msra.mxu0 %v1921_v7  ;;  %1748 = vmatprep.mubr.msk.bf16.mxu0 %vm1944_vm14, %v1943_v9 }
 0x247   : > { %1734 = vmatprep.subr.bf16.mxu0 %v1943_v9 }
 0x248   : > { %v987_v0 = vsel %vm972_vm12, %v970_v60, %v1883_v58  ;;  %v988_v1 = vsel %vm972_vm12, %v971_v59, %v1884_v57 }
 0x249   : > { %v1902_v34 = vpop.permute.xlu0 %1901 }
 0x24a   : > { %v1904_v61 = vunpack.i.h.bf16 %v1902_v34  ;;  %v1903_v63 = vunpack.i.l.bf16 %v1902_v34  ;;  %1735 = vmatpush3.bf16.msra.mxu0 %v1922_v2 }
 0x24b   : > { %1736 = vmatprep.subr.bf16.mxu0 %v1943_v9 }
 0x24c   : > { %v1004_v3 = vsel %vm989_vm13, %v987_v0, %v1903_v63  ;;  %v1005_v5 = vsel %vm989_vm13, %v988_v1, %v1904_v61 }
 0x24d   : > { %v1013_v6 = vpack.c.bf16 %v1005_v5, %v1004_v3 }
 0x24e   : > { %1737 = vmatpush3.bf16.msra.mxu0 %v1923_v8 }
 0x24f   : > { %1729 = vmatmul.mubr.bf16.gmra.mrb[12].mxu1 %v1013_v6  ;;  %1738 = vmatprep.subr.bf16.mxu0 %v1943_v9 }
 0x252   : > { %1739 = vmatpush3.bf16.msra.mxu0 %v1924_v10 }
 0x253   : > { %1740 = vmatprep.subr.bf16.mxu0 %v1943_v9 }
 0x256   : > { %1741 = vmatpush3.bf16.msra.mxu0 %v1925_v11 }
 0x257   : > { %1742 = vmatprep.subr.bf16.mxu0 %v1943_v9 }
 0x25a   : > { %1743 = vmatpush3.bf16.msra.mxu0 %v1926_v12 }
 0x25b   : > { %1744 = vmatprep.subr.bf16.mxu0 %v1943_v9 }
 0x25e   : > { %1745 = vmatpush3.bf16.msra.mxu0 %v1927_v56 }
 0x25f   : > { %1746 = vmatprep.subr.bf16.mxu0 %v1943_v9 }
 0x262   : > { %1747 = vmatpush3.bf16.msra.mxu0 %v1928_v13 }
 0x2e6   : > { %v1718_v19 = vpop.f32.mrb[0].mxu1 }
 0x2e7   : > { %v1128_v20 = vadd.f32 %v1718_v19, %v2446_v40  ;;  %v1119_v21 = vpop.f32.mrb[1].mxu1 }
 0x2e8   : > { %v1120_v22 = vadd.f32 %v2446_v40, %v1119_v21  ;;  %v1719_v26 = vpop.f32.mrb[2].mxu1 }
 0x2e9   : > { %v1184_v30 = vmax.f32 %v1128_v20, 0.0  ;;  %v1131_v31 = vadd.f32 %v1719_v26, %v2446_v40  ;;  %v1122_v32 = vpop.f32.mrb[3].mxu1 }
 0x2ea   : > { %v1182_v33 = vmax.f32 %v1120_v22, 0.0  ;;  %v1123_v36 = vadd.f32 %v2446_v40, %v1122_v32 }
 0x2eb   : > { %v1207_v37 = vsel %vm2450_vm15, %v1184_v30, 0.0  ;;  %v1185_v41 = vmax.f32 %v1131_v31, 0.0 }
 0x2ec   : > { %v1233_v38 = vrot.slane %v1207_v37, 4  ;;  %v1205_v16 = vsel %vm2450_vm15, %v1182_v33, 0.0  ;;  %v1183_v39 = vmax.f32 %v1123_v36, 0.0 }
 0x2ed   : > { %v1221_v42 = vrot.slane %v1205_v16, 4  ;;  %v1208_v43 = vsel %vm2450_vm15, %v1185_v41, 0.0 }
 0x2ee   : > { %v1234_v44 = vmax.f32 %v1207_v37, %v1233_v38  ;;  %v1239_v23 = vrot.slane %v1208_v43, 4  ;;  %v1206_v45 = vsel %vm2450_vm15, %v1183_v39, 0.0 }
 0x2ef   : > { %v1222_v17 = vmax.f32 %v1205_v16, %v1221_v42  ;;  %v1227_v46 = vrot.slane %v1206_v45, 4 }
 0x2f0   : > { %v1235_v47 = vrot.slane %v1234_v44, 2  ;;  %v1240_v62 = vmax.f32 %v1208_v43, %v1239_v23 }
 0x2f1   : > { %v1223_v51 = vrot.slane %v1222_v17, 2  ;;  %v1228_v35 = vmax.f32 %v1206_v45, %v1227_v46 }
 0x2f2   : > { %v1236_v49 = vmax.f32 %v1234_v44, %v1235_v47  ;;  %v1241_v25 = vrot.slane %v1240_v62, 2 }
 0x2f3   : > { %v1224_v50 = vmax.f32 %v1222_v17, %v1223_v51  ;;  %v1229_v52 = vrot.slane %v1228_v35, 2 }
 0x2f4   : > { %v1237_v14 = vrot.slane %v1236_v49, 1  ;;  %v1242_v53 = vmax.f32 %v1240_v62, %v1241_v25 }
 0x2f5   : > { %v1225_v4 = vrot.slane %v1224_v50, 1  ;;  %v1230_v24 = vmax.f32 %v1228_v35, %v1229_v52 }
 0x2f6   : > { %v1238_v54 = vmax.f32 %v1236_v49, %v1237_v14  ;;  %v1243_v29 = vrot.slane %v1242_v53, 1 }
 0x2f7   : > { %v1226_v55 = vmax.f32 %v1224_v50, %v1225_v4  ;;  %v1231_v57 = vrot.slane %v1230_v24, 1 }
 0x2f8   : > { %v1244_v58 = vmax.f32 %v1242_v53, %v1243_v29  ;;  %v1319_v60 = vpack.c.bf16 %v1238_v54, %v1238_v54 }
 0x2f9   : > { %v1317_v34 = vpack.c.bf16 %v1226_v55, %v1226_v55  ;;  %v1232_v59 = vmax.f32 %v1230_v24, %v1231_v57 }
 0x2fa   : > { %v1320_v61 = vpack.c.bf16 %v1244_v58, %v1244_v58  ;;  %v1374_v3 = vunpack.c.l.b16 %v1319_v60 }
 0x2fb   : > { %v1318_v63 = vpack.c.bf16 %v1232_v59, %v1232_v59  ;;  %v1372_v0 = vunpack.c.l.b16 %v1317_v34 }
 0x2fc   : > { %v1375_v6 = vunpack.c.l.b16 %v1320_v61 }
 0x2fd   : > { %v1373_v1 = vunpack.c.l.b16 %v1318_v63 }
 0x2fe   : > { %v1722_v5 = vpop.f32.mrb[4].mxu1 }
 0x2ff   : > { %v1389_v7 = vsel %vm1388_vm0, %v1373_v1, %v1372_v0  ;;  %v1144_v9 = vadd.f32 %v1722_v5, %v2446_v40  ;;  %v1135_v2 = vpop.f32.mrb[5].mxu1 }
 0x300   : > { %v1391_v8 = vsel %vm1390_vm1, %v1374_v3, %v1389_v7  ;;  %v1136_v10 = vadd.f32 %v2446_v40, %v1135_v2  ;;  %v1723_v11 = vpop.f32.mrb[6].mxu1 }
 0x301   : > { %v1188_v12 = vmax.f32 %v1144_v9, 0.0  ;;  %v1393_v56 = vsel %vm1392_vm2, %v1375_v6, %v1391_v8  ;;  %v1147_v13 = vadd.f32 %v1723_v11, %v2446_v40  ;;  %v1138_v48 = vpop.f32.mrb[7].mxu1 }
 0x302   : > { %v1186_v15 = vmax.f32 %v1136_v10, 0.0  ;;  %v1139_v18 = vadd.f32 %v2446_v40, %v1138_v48 }
 0x303   : > { %v1211_v27 = vsel %vm2450_vm15, %v1188_v12, 0.0  ;;  %v1189_v19 = vmax.f32 %v1147_v13, 0.0 }
 0x304   : > { %v1257_v20 = vrot.slane %v1211_v27, 4  ;;  %v1209_v21 = vsel %vm2450_vm15, %v1186_v15, 0.0  ;;  %v1187_v22 = vmax.f32 %v1139_v18, 0.0 }
 0x305   : > { %v1245_v26 = vrot.slane %v1209_v21, 4  ;;  %v1212_v30 = vsel %vm2450_vm15, %v1189_v19, 0.0 }
 0x306   : > { %v1258_v31 = vmax.f32 %v1211_v27, %v1257_v20  ;;  %v1263_v32 = vrot.slane %v1212_v30, 4  ;;  %v1210_v33 = vsel %vm2450_vm15, %v1187_v22, 0.0 }
 0x307   : > { %v1246_v36 = vmax.f32 %v1209_v21, %v1245_v26  ;;  %v1251_v37 = vrot.slane %v1210_v33, 4 }
 0x308   : > { %v1259_v41 = vrot.slane %v1258_v31, 2  ;;  %v1264_v38 = vmax.f32 %v1212_v30, %v1263_v32 }
 0x309   : > { %v1247_v16 = vrot.slane %v1246_v36, 2  ;;  %v1252_v39 = vmax.f32 %v1210_v33, %v1251_v37 }
 0x30a   : > { %v1260_v42 = vmax.f32 %v1258_v31, %v1259_v41  ;;  %v1265_v43 = vrot.slane %v1264_v38, 2 }
 0x30b   : > { %v1248_v44 = vmax.f32 %v1246_v36, %v1247_v16  ;;  %v1253_v23 = vrot.slane %v1252_v39, 2 }
 0x30c   : > { %v1261_v45 = vrot.slane %v1260_v42, 1  ;;  %v1266_v17 = vmax.f32 %v1264_v38, %v1265_v43 }
 0x30d   : > { %v1249_v46 = vrot.slane %v1248_v44, 1  ;;  %v1254_v47 = vmax.f32 %v1252_v39, %v1253_v23 }
 0x30e   : > { %v1262_v62 = vmax.f32 %v1260_v42, %v1261_v45  ;;  %v1267_v51 = vrot.slane %v1266_v17, 1 }
 0x30f   : > { %v1250_v35 = vmax.f32 %v1248_v44, %v1249_v46  ;;  %v1255_v49 = vrot.slane %v1254_v47, 1 }
 0x310   : > { %v1268_v25 = vmax.f32 %v1266_v17, %v1267_v51  ;;  %v1323_v14 = vpack.c.bf16 %v1262_v62, %v1262_v62 }
 0x311   : > { %v1321_v50 = vpack.c.bf16 %v1250_v35, %v1250_v35  ;;  %v1256_v52 = vmax.f32 %v1254_v47, %v1255_v49 }
 0x312   : > { %v1324_v4 = vpack.c.bf16 %v1268_v25, %v1268_v25  ;;  %v1378_v55 = vunpack.c.l.b16 %v1323_v14 }
 0x313   : > { %v1376_v53 = vunpack.c.l.b16 %v1321_v50  ;;  %v1322_v24 = vpack.c.bf16 %v1256_v52, %v1256_v52 }
 0x314   : > { %v1379_v58 = vunpack.c.l.b16 %v1324_v4 }
 0x315   : > { %v1395_v54 = vsel %vm1394_vm3, %v1376_v53, %v1393_v56  ;;  %v1377_v29 = vunpack.c.l.b16 %v1322_v24 }
 0x316   : > { %v1726_v57 = vpop.f32.mrb[8].mxu1 }
 0x317   : > { %v1397_v34 = vsel %vm1396_vm4, %v1377_v29, %v1395_v54  ;;  %v1160_v59 = vadd.f32 %v1726_v57, %v2446_v40  ;;  %v1151_v60 = vpop.f32.mrb[9].mxu1 }
 0x318   : > { %v1152_v61 = vadd.f32 %v2446_v40, %v1151_v60  ;;  %v1727_v63 = vpop.f32.mrb[10].mxu1  ;;  %v1399_v0 = vsel %vm1398_vm5, %v1378_v55, %v1397_v34 }
 0x319   : > { %v1192_v1 = vmax.f32 %v1160_v59, 0.0  ;;  %v1163_v3 = vadd.f32 %v1727_v63, %v2446_v40  ;;  %v1154_v5 = vpop.f32.mrb[11].mxu1  ;;  %v2487_v6 = vsel %vm1400_vm6, %v1379_v58, %v1399_v0 }
 0x31a   : > { %v1190_v7 = vmax.f32 %v1152_v61, 0.0  ;;  %v1155_v9 = vadd.f32 %v2446_v40, %v1154_v5 }
 0x31b   : > { %v1215_v2 = vsel %vm2450_vm15, %v1192_v1, 0.0  ;;  %v1193_v8 = vmax.f32 %v1163_v3, 0.0 }
 0x31c   : > { %v1281_v10 = vrot.slane %v1215_v2, 4  ;;  %v1213_v11 = vsel %vm2450_vm15, %v1190_v7, 0.0  ;;  %v1191_v12 = vmax.f32 %v1155_v9, 0.0 }
 0x31d   : > { %v1269_v56 = vrot.slane %v1213_v11, 4  ;;  %v1216_v13 = vsel %vm2450_vm15, %v1193_v8, 0.0 }
 0x31e   : > { %v1282_v48 = vmax.f32 %v1215_v2, %v1281_v10  ;;  %v1287_v15 = vrot.slane %v1216_v13, 4  ;;  %v1214_v18 = vsel %vm2450_vm15, %v1191_v12, 0.0 }
 0x31f   : > { %v1270_v27 = vmax.f32 %v1213_v11, %v1269_v56  ;;  %v1275_v19 = vrot.slane %v1214_v18, 4 }
 0x320   : > { %v1283_v20 = vrot.slane %v1282_v48, 2  ;;  %v1288_v21 = vmax.f32 %v1216_v13, %v1287_v15 }
 0x321   : > { %v1271_v22 = vrot.slane %v1270_v27, 2  ;;  %v1276_v26 = vmax.f32 %v1214_v18, %v1275_v19 }
 0x322   : > { %v1284_v30 = vmax.f32 %v1282_v48, %v1283_v20  ;;  %v1289_v31 = vrot.slane %v1288_v21, 2  ;;  %v1730_v32 = vpop.f32.mrb[12].mxu1 }
 0x323   : > { %v1272_v33 = vmax.f32 %v1270_v27, %v1271_v22  ;;  %v1277_v36 = vrot.slane %v1276_v26, 2  ;;  %v1176_v37 = vadd.f32 %v1730_v32, %v2446_v40  ;;  %v1167_v41 = vpop.f32.mrb[13].mxu1 }
 0x324   : > { %v1285_v38 = vrot.slane %v1284_v30, 1  ;;  %v1290_v16 = vmax.f32 %v1288_v21, %v1289_v31  ;;  %v1168_v39 = vadd.f32 %v2446_v40, %v1167_v41  ;;  %v1731_v42 = vpop.f32.mrb[14].mxu1 }
 0x325   : > { %v1273_v43 = vrot.slane %v1272_v33, 1  ;;  %v1278_v44 = vmax.f32 %v1276_v26, %v1277_v36  ;;  %v1196_v23 = vmax.f32 %v1176_v37, 0.0  ;;  %v1179_v45 = vadd.f32 %v1731_v42, %v2446_v40  ;;  %v1170_v17 = vpop.f32.mrb[15].mxu1 }
 0x326   : > { %v1286_v46 = vmax.f32 %v1284_v30, %v1285_v38  ;;  %v1291_v47 = vrot.slane %v1290_v16, 1  ;;  %v1194_v62 = vmax.f32 %v1168_v39, 0.0  ;;  %v1171_v51 = vadd.f32 %v2446_v40, %v1170_v17  ;;  %v1616_v17 = vld [vmem:[%s2535_s6] ss:$0 sm:$0xff] }
 0x327   : > { %v1274_v35 = vmax.f32 %v1272_v33, %v1273_v43  ;;  %v1279_v49 = vrot.slane %v1278_v44, 1  ;;  %v1219_v25 = vsel %vm2450_vm15, %v1196_v23, 0.0  ;;  %v1197_v50 = vmax.f32 %v1179_v45, 0.0 }
 0x328   : > { %v1292_v52 = vmax.f32 %v1290_v16, %v1291_v47  ;;  %v1305_v14 = vrot.slane %v1219_v25, 4  ;;  %v1217_v53 = vsel %vm2450_vm15, %v1194_v62, 0.0  ;;  %v1327_v55 = vpack.c.bf16 %v1286_v46, %v1286_v46 }
 0x329   : > { %v1325_v4 = vpack.c.bf16 %v1274_v35, %v1274_v35  ;;  %v1280_v24 = vmax.f32 %v1278_v44, %v1279_v49  ;;  %v1293_v54 = vrot.slane %v1217_v53, 4  ;;  %v1220_v29 = vsel %vm2450_vm15, %v1197_v50, 0.0 }
 0x32a   : > { %v1306_v57 = vmax.f32 %v1219_v25, %v1305_v14  ;;  %v1311_v40 = vrot.slane %v1220_v29, 4  ;;  %v1328_v58 = vpack.c.bf16 %v1292_v52, %v1292_v52  ;;  %v1195_v60 = vmax.f32 %v1171_v51, 0.0 }
 0x32b   : > { %v1326_v34 = vpack.c.bf16 %v1280_v24, %v1280_v24  ;;  %v1294_v59 = vmax.f32 %v1217_v53, %v1293_v54  ;;  %v1380_v0 = vunpack.c.l.b16 %v1325_v4  ;;  %v1382_v7 = vunpack.c.l.b16 %v1327_v55 }
 0x32c   : > { %v1307_v61 = vrot.slane %v1306_v57, 2  ;;  %v1312_v63 = vmax.f32 %v1220_v29, %v1311_v40  ;;  %v1218_v5 = vsel %vm2450_vm15, %v1195_v60, 0.0  ;;  %v1383_v10 = vunpack.c.l.b16 %v1328_v58 }
 0x32d   : > { %v1381_v1 = vunpack.c.l.b16 %v1326_v34  ;;  %v1295_v3 = vrot.slane %v1294_v59, 2  ;;  %v1299_v8 = vrot.slane %v1218_v5, 4 }
 0x32e   : > { %v1308_v9 = vmax.f32 %v1306_v57, %v1307_v61  ;;  %v1313_v2 = vrot.slane %v1312_v63, 2 }
 0x32f   : > { %v1402_v11 = vsel %vm1388_vm0, %v1381_v1, %v1380_v0  ;;  %v1296_v12 = vmax.f32 %v1294_v59, %v1295_v3  ;;  %v1300_v48 = vmax.f32 %v1218_v5, %v1299_v8 }
 0x330   : > { %v1403_v56 = vsel %vm1390_vm1, %v1382_v7, %v1402_v11  ;;  %v1314_v13 = vmax.f32 %v1312_v63, %v1313_v2  ;;  %v1309_v15 = vrot.slane %v1308_v9, 1 }
 0x331   : > { %v1297_v18 = vrot.slane %v1296_v12, 1  ;;  %v1404_v27 = vsel %vm1392_vm2, %v1383_v10, %v1403_v56  ;;  %v1301_v20 = vrot.slane %v1300_v48, 2 }
 0x332   : > { %v1315_v19 = vrot.slane %v1314_v13, 1  ;;  %v1310_v22 = vmax.f32 %v1308_v9, %v1309_v15 }
 0x333   : > { %v1298_v28 = vmax.f32 %v1296_v12, %v1297_v18  ;;  %v1302_v21 = vmax.f32 %v1300_v48, %v1301_v20 }
 0x334   : > { %v1316_v30 = vmax.f32 %v1314_v13, %v1315_v19  ;;  %v1331_v36 = vpack.c.bf16 %v1310_v22, %v1310_v22 }
 0x335   : > { %v1329_v26 = vpack.c.bf16 %v1298_v28, %v1298_v28  ;;  %v1303_v31 = vrot.slane %v1302_v21, 1 }
 0x336   : > { %v1332_v41 = vpack.c.bf16 %v1316_v30, %v1316_v30  ;;  %v1386_v39 = vunpack.c.l.b16 %v1331_v36 }
 0x337   : > { %v1384_v32 = vunpack.c.l.b16 %v1329_v26  ;;  %v1304_v33 = vmax.f32 %v1302_v21, %v1303_v31 }
 0x338   : > { %v1387_v42 = vunpack.c.l.b16 %v1332_v41 }
 0x339   : > { %v1405_v37 = vsel %vm1394_vm3, %v1384_v32, %v1404_v27  ;;  %v1330_v38 = vpack.c.bf16 %v1304_v33, %v1304_v33 }
 0x33b   : > { %v1385_v16 = vunpack.c.l.b16 %v1330_v38 }
 0x33d   : > { %v1406_v43 = vsel %vm1396_vm4, %v1385_v16, %v1405_v37 }
 0x33e   : > { %v1407_v44 = vsel %vm1398_vm5, %v1386_v39, %v1406_v43 }
 0x33f   : > { %v1408_v23 = vsel %vm1400_vm6, %v1387_v42, %v1407_v44 }
 0x340   : > { %v1409_v45 = vpack.c.b16 %v1408_v23, %v2487_v6 }
 0x342   : > { %1749 = vmatmul.mubr.bf16.vlgmr.msra.gmra.mrb[16].mxu0 %v1409_v45 }
 0x415   : > { %v1493_v46 = vpop.f32.mrb[16].mxu0 }
 0x416   : > { %v1494_v47 = vadd.f32 %v1616_v17, %v1493_v46  ;;  %v1750_v62 = vpop.f32.mrb[17].mxu0 }
 0x417   : > { %v1496_v51 = vpop.f32.mrb[18].mxu0 }
 0x418   : > { %1500 = vst [vmem:[%s280_s29] sm:$0xff] %v1494_v47  ;;  %v1497_v6 = vadd.f32 %v1616_v17, %v1496_v51  ;;  %v1751_v35 = vpop.f32.mrb[19].mxu0 }
 0x41a   : > { %1501 = vst [vmem:[%s280_s29 + $0x8] sm:$0xff] %v1497_v6 }
 0x41b PF: > { %s17_s24 = sadd.s32 1, %s1935_s24  }
 0x41c   : > { %p14_p5 = scmp.ge.s32.totalorder %s17_s24, 4  }
 0x41e   :  { %16 = sbr.rel (!%p14_p5) target bundleno = 1 (0x1), region = 78 }

</bundles_post_ra>
